<compile_context>
chip_gen: v7x
topology: tpu7x:2x2x1
jax: 0.10.0
libtpu: 0.0.40
codegen_flags: <defaults>
</compile_context>

<pallas_src>
import functools

import jax
import jax.numpy as jnp
from jax import lax
from jax.experimental import pallas as pl
from jax.experimental.pallas import tpu as pltpu

K = 3  # kernel_size
S = 3  # stride (nn.MaxPool2d defaults stride to kernel_size)


def _pool_out_size(size: int, k: int, s: int, ceil_mode: bool) -> int:
    """Replicates PyTorch's MaxPool2d output-size formula (padding=0)."""
    if ceil_mode:
        out = -(-(size - k) // s) + 1
        # PyTorch: the last pooling window must start inside the input.
        if (out - 1) * s >= size:
            out -= 1
    else:
        out = (size - k) // s + 1
    return max(out, 0)


def _pool_sublane_axis(x, n_full: int, n_out: int):
    """Max-pool axis 1 of a (BB, L, M) VMEM array with window=stride=3.

    `n_full` windows are fully inside [0, L); if ceil_mode adds one ragged
    window (`n_out == n_full + 1`) it is computed from a clamped slice —
    no -inf padding, no whole-array copy.
    """
    bb, L, M = x.shape
    parts = []
    if n_full > 0:
        body = x[:, : 3 * n_full, :].reshape(bb, n_full, 3, M)
        parts.append(jnp.max(body, axis=2))                  # (BB, n_full, M)
    if n_out > n_full:
        tail = jnp.max(x[:, 3 * n_full :, :], axis=1, keepdims=True)
        parts.append(tail)                                    # (BB, 1, M)
    if len(parts) == 1:
        return parts[0]
    return jnp.concatenate(parts, axis=1)                     # (BB, n_out, M)


def _maxpool_kernel(x_ref, o_ref, *, H, W, OH, OW):
    # x_ref block: (BB, H, W)   o_ref block: (BB, OH, OW)   (BB = N*C tile)
    x = x_ref[...]

    # Pass 1 — pool along H (sublane axis): grouped reduce, no transpose.
    ph = _pool_sublane_axis(x, H // 3, OH)                    # (BB, OH, W)

    # Pass 2 — pool along W: one in-VMEM transpose moves W onto sublanes
    # (XLU work on an intermediate already 3x smaller than the input, zero
    # HBM traffic), grouped reduce, transpose back.
    pt = jnp.swapaxes(ph, 1, 2)                               # (BB, W, OH)
    pw = _pool_sublane_axis(pt, W // 3, OW)                   # (BB, OW, OH)

    # Single full-block store.
    o_ref[...] = jnp.swapaxes(pw, 1, 2)                       # (BB, OH, OW)


def _choose_block_b(B, H, W, itemsize):
    """Pick the N*C tile: big enough to amortize per-step overhead (~0.35us),
    small enough that double-buffered in/out blocks + temporaries fit default
    scoped VMEM on v5e/v6e/v7x, and >=2 grid steps so both v7x cores work."""
    budget_bytes = 2 * 1024 * 1024            # per input block
    bb = max(1, min(B, budget_bytes // max(1, H * W * itemsize)))
    if B >= 2:
        bb = min(bb, pl.cdiv(B, 2))
    return bb


def maxpool2d_ceil(x_nchw: jax.Array) -> jax.Array:
    """MaxPool2d(kernel_size=3, ceil_mode=True) on an NCHW input."""
    N, C, H, W = x_nchw.shape
    OH = _pool_out_size(H, K, S, ceil_mode=True)
    OW = _pool_out_size(W, K, S, ceil_mode=True)

    B = N * C
    x = x_nchw.reshape(B, H, W)       # contiguous merge of leading dims: free

    BB = _choose_block_b(B, H, W, x.dtype.itemsize)
    grid = (pl.cdiv(B, BB),)

    kernel = functools.partial(_maxpool_kernel, H=H, W=W, OH=OH, OW=OW)

    out = pl.pallas_call(
        kernel,
        out_shape=jax.ShapeDtypeStruct((B, OH, OW), x.dtype),
        grid_spec=pl.GridSpec(
            grid=grid,
            in_specs=[pl.BlockSpec((BB, H, W), lambda b: (b, 0, 0))],
            out_specs=pl.BlockSpec((BB, OH, OW), lambda b: (b, 0, 0)),
        ),
        compiler_params=pltpu.CompilerParams(
            dimension_semantics=("parallel",)),
    )(x)

    return out.reshape(N, C, OH, OW)  # free split of the leading dim


def _reference_maxpool(x_nchw: jax.Array) -> jax.Array:
    """Pure-JAX reference (lax.reduce_window) matching ceil_mode=True."""
    N, C, H, W = x_nchw.shape
    OH = _pool_out_size(H, K, S, ceil_mode=True)
    OW = _pool_out_size(W, K, S, ceil_mode=True)
    pad_h = max((OH - 1) * S + K - H, 0)
    pad_w = max((OW - 1) * S + K - W, 0)
    return lax.reduce_window(
        x_nchw,
        -jnp.inf,
        lax.max,
        window_dimensions=(1, 1, K, K),
        window_strides=(1, 1, S, S),
        padding=((0, 0), (0, 0), (0, pad_h), (0, pad_w)),
    )


if __name__ == "__main__":
    key = jax.random.PRNGKey(0)
    x = jax.random.normal(key, (2, 4, 16, 16), dtype=jnp.float32)  # NCHW

    out = jax.jit(maxpool2d_ceil)(x)
    out = jax.block_until_ready(out)

    ref = _reference_maxpool(x)
    assert out.shape == ref.shape == (2, 4, 6, 6), (out.shape, ref.shape)
    assert jnp.allclose(out, ref), "Pallas maxpool mismatch vs reference"

    print("KERNEL_OK")
</pallas_src>

<mosaic_0001>
module attributes {stable_mosaic.version = 11 : i64} {
  func.func @_maxpool_kernel(%arg0: i32, %arg1: memref<4x16x16xf32, #tpu.memory_space<vmem>>, %arg2: memref<4x6x6xf32, #tpu.memory_space<vmem>>) attributes {dimension_semantics = [#tpu.dimension_semantics<parallel>], iteration_bounds = array<i64: 2>, scalar_prefetch = 0 : i64, scratch_operands = 0 : i64, tpu.core_type = #tpu.core_type<tc>, window_params = [{transform_indices = @transform_0, window_bounds = array<i64: 4, 16, 16>}, {transform_indices = @transform_1, window_bounds = array<i64: 4, 6, 6>}]} {
    %c0 = arith.constant 0 : index
    %c0_0 = arith.constant 0 : index
    %c0_1 = arith.constant 0 : index
    %0 = vector.load %arg1[%c0, %c0_0, %c0_1] : memref<4x16x16xf32, #tpu.memory_space<vmem>>, vector<4x16x16xf32>
    %1 = vector.extract_strided_slice %0 {offsets = [0, 0, 0], sizes = [4, 15, 16], strides = [1, 1, 1]} : vector<4x16x16xf32> to vector<4x15x16xf32>
    %2 = vector.shape_cast %1 : vector<4x15x16xf32> to vector<4x5x3x16xf32>
    %cst = arith.constant dense<0xFF800000> : vector<4x5x16xf32>
    %3 = vector.multi_reduction <maximumf>, %2, %cst [2] : vector<4x5x3x16xf32> to vector<4x5x16xf32>
    %4 = vector.extract_strided_slice %0 {offsets = [0, 15, 0], sizes = [4, 1, 16], strides = [1, 1, 1]} : vector<4x16x16xf32> to vector<4x1x16xf32>
    %cst_2 = arith.constant dense<0xFF800000> : vector<4x16xf32>
    %5 = vector.multi_reduction <maximumf>, %4, %cst_2 [1] : vector<4x1x16xf32> to vector<4x16xf32>
    %6 = vector.shape_cast %5 : vector<4x16xf32> to vector<4x1x16xf32>
    %7 = tpu.concatenate %3, %6 in 1 : vector<4x5x16xf32>, vector<4x1x16xf32> -> vector<4x6x16xf32>
    %8 = tpu.transpose %7, [0, 2, 1] : vector<4x6x16xf32> -> vector<4x16x6xf32>
    %9 = vector.extract_strided_slice %8 {offsets = [0, 0, 0], sizes = [4, 15, 6], strides = [1, 1, 1]} : vector<4x16x6xf32> to vector<4x15x6xf32>
    %10 = vector.shape_cast %9 : vector<4x15x6xf32> to vector<4x5x3x6xf32>
    %cst_3 = arith.constant dense<0xFF800000> : vector<4x5x6xf32>
    %11 = vector.multi_reduction <maximumf>, %10, %cst_3 [2] : vector<4x5x3x6xf32> to vector<4x5x6xf32>
    %12 = vector.extract_strided_slice %8 {offsets = [0, 15, 0], sizes = [4, 1, 6], strides = [1, 1, 1]} : vector<4x16x6xf32> to vector<4x1x6xf32>
    %cst_4 = arith.constant dense<0xFF800000> : vector<4x6xf32>
    %13 = vector.multi_reduction <maximumf>, %12, %cst_4 [1] : vector<4x1x6xf32> to vector<4x6xf32>
    %14 = vector.shape_cast %13 : vector<4x6xf32> to vector<4x1x6xf32>
    %15 = tpu.concatenate %11, %14 in 1 : vector<4x5x6xf32>, vector<4x1x6xf32> -> vector<4x6x6xf32>
    %16 = tpu.transpose %15, [0, 2, 1] : vector<4x6x6xf32> -> vector<4x6x6xf32>
    %c0_5 = arith.constant 0 : index
    %c0_6 = arith.constant 0 : index
    %c0_7 = arith.constant 0 : index
    %17 = vector.load %arg2[%c0_5, %c0_6, %c0_7] : memref<4x6x6xf32, #tpu.memory_space<vmem>>, vector<4x6x6xf32>
    tpu.vector_store %arg2[%c0_5, %c0_6, %c0_7], %16 {strides = array<i32>} : memref<4x6x6xf32, #tpu.memory_space<vmem>>, vector<4x6x6xf32>,
    return
  }
  func.func @transform_0(%arg0: i32) -> (i32, i32, i32) {
    %c0_i32 = arith.constant 0 : i32
    %c0_i32_0 = arith.constant 0 : i32
    %c0_i32_1 = arith.constant 0 : i32
    return %arg0, %c0_i32, %c0_i32_0 : i32, i32, i32
  }
  func.func @transform_1(%arg0: i32) -> (i32, i32, i32) {
    %c0_i32 = arith.constant 0 : i32
    %c0_i32_0 = arith.constant 0 : i32
    %c0_i32_1 = arith.constant 0 : i32
    return %arg0, %c0_i32, %c0_i32_0 : i32, i32, i32
  }
}

</mosaic_0001>

<bundles_post_ra>
// kernel: maxpool2d_ceil.1
= control target key start
LH: loop header
LB: loop body
LE: loop exit
PB: predicated region body
PF: predicated region fallthrough
CT: control target
= control target key end

     0   :  { %6 = vsyncpa [#allocation3], 0  ;;  %s3291_s0 = inlined_call_operand.hbm [shape: f32[8,16,16], index: 0, kind: input, shape index: {}]   ;;  %s3292_s1 = inlined_call_operand.vmem [shape: f32[8,6,6], index: 1, kind: output, shape index: {}]  }
   0x1   :  { %8 = vsyncpa [#allocation3 + $0x1], 0  ;;  %s2774_s6 = smov 0   ;;  %s2776_s7 = smov 0  }
   0x2   :  { %s2778_s8 = smov 0   ;;  %s2780_s9 = smov 0  }
   0x3 LB: > { %s2619_s10 = sadd.s32 4294967295, %s2758_s9   ;;  %s2794_s11 = sadd.s32 1, %s2758_s9   ;;  %s2758_s9 = sphi %s2780_s9, %s3299_s9   ;;  %s2754_s8 = sphi %s2778_s8, %s3298_s8   ;;  %s2750_s7 = sphi %s2776_s7, %s3297_s7   ;;  %s2746_s6 = sphi %s2774_s6, %s3296_s6  }
   0x4   : > { %s18_s12 = ssub.s32 %s2758_s9, %s2794_s11  ;;  %s21_s13 = sadd.s32 1, %s2754_s8 }
   0x5   : > { %p19_p0 = scmp.eq.s32.totalorder %s18_s12, 0  ;;  %p28_p1 = scmp.ne.s32.totalorder %s2754_s8, %s2750_s7 }
   0x6   : > { %p29_p2 = scmp.eq.s32.totalorder %s2758_s9, 0  ;;  %p34_p3 = scmp.ne.s32.totalorder %s2750_s7, %s2746_s6 }
   0x7   : > { %s2804_s14 = scalar_select %p19_p0, %s2754_s8, %s21_s13  }
   0x8   : > { %p30_p4 = por %p29_p2, %p28_p1  ;;  %p35_p5 = scmp.eq.s32.totalorder %s2619_s10, 0 }
   0x9   : > { %p2649_p6 = scmp.lt.s32.totalorder %s2758_s9, 2  ;;  %s84_s16 = sand.u32 1, %s2754_s8  }
   0xa   : > { %p2809_p7 = por %p35_p5, %p34_p3  ;;  %s2623_s17 = sshll.u32 %s84_s16, 6 }
   0xb   : > { %s2642_s18 = sshll.u32 %s2758_s9, 10  ;;  %s88_s22 = scalar_lea.vmem [#allocation2], %s2623_s17 }
   0xc   : > { %s2818_s21 = scalar_lea.hbm %s3291_s0, %s2642_s18  ;;  %s96_s23 = sshll.u32 %s88_s22, 4  ;;  %s2820_s23 = int_to_ptr.vmem [resolvable:$true] %s96_s23 }
   0xd   : > { %p2822_p8 = pnand %p2649_p6, %p30_p4  ;;  %s2827_s25 = scalar_lea.sflag [#allocation3], %s84_s16 }
   0xe   : > { %s2694_s26 = scalar_lea.hbm %s2818_s21, 1024  ;;  %s2699_s29 = scalar_lea.hbm %s3291_s0, 2048 }
   0xf   : > { %p2695_p10 = scmp.ne.s32.totalorder %s2818_s21, %s2694_s26  ;;  %p2696_p11 = pneg %p2822_p8 }
  0x10   : > { %p2700_p0 = scmp.lt.u32.totalorder %s2818_s21, %s3291_s0  ;;  %p2701_p1 = scmp.lt.u32.totalorder %s2699_s29, %s2694_s26 }
  0x11   : > { %p2697_p12 = pnand %p2696_p11, %p2695_p10  ;;  %p2703_p3 = scmp.lt.u32.totalorder %s2694_s26, %s2818_s21 }
  0x12   : > { %p2702_p2 = por %p2701_p1, %p2700_p0 }
  0x13   : > { %p2698_p13 = pneg %p2697_p12 }
  0x14   : > { %p2704_p4 = por %p2703_p3, %p2702_p2 }
  0x16   : > { %p2705_p5 = pnand %p2704_p4, %p2698_p13 }
  0x18   : > { %2708 = shalt.err (!%p2705_p5)
}
  0x19   : > { %s2709_s3 = scalar_lea.vmem %s2820_s23, 1024  ;;  %s2760_s4 = smov [#allocation2]  }
  0x1a   : > { %p2710_p6 = scmp.ne.s32.totalorder %s2820_s23, %s2709_s3  ;;  %s2714_s5 = sshll.u32 %s2760_s4, 4  ;;  %s2715_s5 = int_to_ptr.vmem [resolvable:$false] %s2714_s5 }
  0x1b   : > { %s2716_s6 = scalar_lea.vmem %s2715_s5, 2048  ;;  %p2717_p9 = scmp.lt.s32.totalorder %s2820_s23, %s2715_s5 }
  0x1c   : > { %p2712_p10 = pnand %p2710_p6, %p2696_p11  ;;  %p2718_p0 = scmp.lt.s32.totalorder %s2716_s6, %s2709_s3 }
  0x1e   : > { %p2713_p12 = pneg %p2712_p10  ;;  %p2719_p1 = por %p2718_p0, %p2717_p9 }
  0x20   : > { %p2720_p2 = pnand %p2719_p1, %p2713_p12 }
  0x22   : > { %2723 = shalt.err (!%p2720_p2)
}
  0x23   : > { %s2761_s12 = smov 128   ;;  %s2762_s13 = smov 8  }
  0x24   : > { %2648 = dma.hbm_to_vmem [thread:$0]  (!%p2822_p8), %s2818_s21, 1024, %s2820_s23, %s2827_s25, %s2761_s12, %s2761_s12, %s2762_s13  }
  0x25   : > { %p104_p11 = scmp.lt.s32.totalorder %s2758_s9, 3  ;;  %p3295_p13 = scmp.ge.s32.totalorder %s2758_s9, 1 }
  0x27   : > { %p105_p3 = pnand %p3295_p13, %p104_p11 }
  0x28   : > { %s110_s16 = sand.u32 (!%p105_p3), 1, %s2750_s7  }
  0x29   : > { %108 = sbr.rel (%p105_p3) target bundleno = 452 (0x1c4), region = 24  ;;  %s2628_s17 = sshll.u32 (!%p105_p3), %s110_s16, 6 }
  0x2a   : > { %s111_s18 = scalar_lea.sflag (!%p105_p3), [#allocation3], %s110_s16  ;;  %s2859_s19 = scalar_lea.vmem (!%p105_p3), [#allocation2], %s2628_s17 }
  0x30   : > { %2741 = dma.done.wait (%p2809_p7), %s111_s18, 1024  }
  0x31   : > { %2743 = vsyncadd (%p2809_p7), %s111_s18, 4294966272  ;;  %v160_v0 = vlaneseq  ;;  %v2763_v1 = vmov 1966171168   ;;  %v144_v6 = vld [vmem:[%s2859_s19 + $0x20] sm:$0xff]  ;;  %v2869_v7 = vld [vmem:[%s2859_s19 + $0x28] sm:$0xff]  ;;  %vm1024_vm0 = vcmask 124928  }
  0x32   : > { %v158_v2 = vunpack.c.l.s4 %v2763_v1  ;;  %v140_v8 = vld [vmem:[%s2859_s19] sm:$0xff]  ;;  %v350_v9 = vcombine.high %v144_v6, %v144_v6  ;;  %v399_v11 = vcombine.high %v2869_v7, %v2869_v7  ;;  %v2878_v13 = vld [vmem:[%s2859_s19 + $0x8] sm:$0xff]  ;;  %v1211_v14 = vrot.slane %v2869_v7, 2  ;;  %s2629_s15 = sshll.u32 %s2619_s10, 2 }
  0x33   : > { %v161_v3 = vshrl.u32 %v160_v0, 7  ;;  %v156_v15 = vcombine.high %v140_v8, %v140_v8  ;;  %v205_v17 = vcombine.high %v2878_v13, %v2878_v13  ;;  %vm1185_vm1 = vcmask 1041409   ;;  %p135_p7 = scmp.lt.s32.totalorder %s2629_s15, 7 }
  0x34   : > { %v159_v4 = vunpack.c.0.s8 %v158_v2  ;;  %vm1187_vm2 = vcmask 1042434   ;;  %vm1189_vm3 = vcmask 1043459   ;;  %vm1191_vm4 = vcmask 1044484  }
  0x35   : > { %vm1217_vm5 = vcmask 1044480   ;;  %vm2226_vm6 = vcmask 43008   ;;  %s3301_s15 = smov (!%p135_p7, %s2629_s15), 7  ;;  %vm2547_vm7 = vcmask 46080  }
  0x36   : > { %v2865_v5 = vsub.s32 %v159_v4, %v161_v3  ;;  %s2630_s20 = sshll.u32 %s3301_s15, 3 }
  0x37   : > { %s138_s23 = scalar_lea.vmem %s3292_s1, %s2630_s20 }
  0x38   : > { %v357_v10 = vrot.slane %v144_v6, %v2865_v5  ;;  %v406_v12 = vrot.slane %v2869_v7, %v2865_v5  ;;  %v163_v16 = vrot.slane %v140_v8, %v2865_v5  ;;  %v364_v18 = vrot.slane %v350_v9, %v2865_v5 }
  0x39   : > { %v413_v21 = vrot.slane %v399_v11, %v2865_v5  ;;  %v170_v24 = vrot.slane %v156_v15, %v2865_v5  ;;  %v212_v11 = vrot.slane %v2878_v13, %v2865_v5 }
  0x3a   : > { %v365_v19 = vcombine.high %v357_v10, %v357_v10  ;;  %v373_v20 = vrot.slane %v357_v10, %v2865_v5  ;;  %v414_v22 = vcombine.high %v406_v12, %v406_v12  ;;  %v422_v23 = vrot.slane %v406_v12, %v2865_v5 }
  0x3b   : > { %v171_v25 = vcombine.high %v163_v16, %v163_v16  ;;  %v366_v26 = vcombine.high %v364_v18, %v364_v18  ;;  %v380_v27 = vrot.slane %v364_v18, %v2865_v5  ;;  %v415_v30 = vcombine.high %v413_v21, %v413_v21 }
  0x3c   : > { %v387_v28 = vrot.slane %v365_v19, %v2865_v5  ;;  %v395_v29 = vcombine.high %v373_v20, %v373_v20  ;;  %v429_v31 = vrot.slane %v413_v21, %v2865_v5  ;;  %v436_v32 = vrot.slane %v414_v22, %v2865_v5 }
  0x3d   : > { %v444_v33 = vcombine.high %v422_v23, %v422_v23  ;;  %v394_v34 = vrot.slane %v366_v26, %v2865_v5  ;;  %v443_v38 = vrot.slane %v415_v30, %v2865_v5  ;;  %v834_v41 = vrot.slane %v422_v23, %v2865_v5 }
  0x3e   : > { %v397_v35 = vcombine.high %v387_v28, %v387_v28  ;;  %v774_v36 = vcombine.low %v373_v20, %v387_v28  ;;  %v788_v37 = vrot.slane %v395_v29, %v2865_v5  ;;  %v445_v39 = vcombine.high %v429_v31, %v429_v31 }
  0x3f   : > { %v446_v40 = vcombine.high %v436_v32, %v436_v32  ;;  %v811_v44 = vrot.slane %v394_v34, %v2865_v5  ;;  %v2633_v45 = vcombine.high %v380_v27, %v394_v34  ;;  %v843_v46 = vcombine.low %v436_v32, %v444_v33 }
  0x40   : > { %v781_v42 = vrot.slane %v774_v36, %v2865_v5  ;;  %v797_v43 = vcombine.low %v397_v35, %v380_v27  ;;  %v866_v48 = vcombine.low %v429_v31, %v443_v38  ;;  %v880_v49 = vrot.slane %v445_v39, %v2865_v5 }
  0x41   : > { %v857_v47 = vrot.slane %v446_v40, %v2865_v5  ;;  %v827_v52 = vrot.slane %v2633_v45, %v2865_v5  ;;  %v172_v53 = vcombine.high %v170_v24, %v170_v24  ;;  %v850_v54 = vrot.slane %v843_v46, %v2865_v5 }
  0x42   : > { %v789_v50 = vcombine.low %v781_v42, %v788_v37  ;;  %v804_v51 = vrot.slane %v797_v43, %v2865_v5  ;;  %v873_v55 = vrot.slane %v866_v48, %v2865_v5  ;;  %v179_v56 = vrot.slane %v163_v16, %v2865_v5 }
  0x43   : > { %v2907_v57 = vrot.slane %v170_v24, %v2865_v5  ;;  %v835_v60 = vcombine.low %v827_v52, %v834_v41  ;;  %v193_v61 = vrot.slane %v171_v25, %v2865_v5  ;;  %v858_v62 = vcombine.low %v850_v54, %v857_v47 }
  0x44   : > { %v796_v58 = vrot.slane %v789_v50, %v2865_v5  ;;  %v812_v59 = vcombine.low %v804_v51, %v811_v44  ;;  %v881_v63 = vcombine.low %v873_v55, %v880_v49  ;;  %v2912_v0 = vrot.slane %v172_v53, %v2865_v5 }
  0x45   : > { %v201_v1 = vcombine.high %v179_v56, %v179_v56  ;;  %v842_v3 = vrot.slane %v835_v60, %v2865_v5  ;;  %v203_v6 = vcombine.high %v193_v61, %v193_v61  ;;  %v865_v8 = vrot.slane %v858_v62, %v2865_v5 }
  0x46   : > { %v819_v2 = vrot.slane %v812_v59, %v2865_v5  ;;  %v1095_v4 = vsel %vm1024_vm0, %v796_v58, -inf  ;;  %v888_v9 = vrot.slane %v881_v63, %v2865_v5  ;;  %v219_v16 = vrot.slane %v205_v17, %v2865_v5 }
  0x47   : > { %v1096_v10 = vrot.slane %v1095_v4, 4  ;;  %v1109_v15 = vsel %vm1024_vm0, %v842_v3, -inf  ;;  %v544_v18 = vcombine.low %v179_v56, %v193_v61  ;;  %v1116_v22 = vsel %vm1024_vm0, %v865_v8, -inf }
  0x48   : > { %v1102_v12 = vsel %vm1024_vm0, %v819_v2, -inf  ;;  %v1110_v21 = vrot.slane %v1109_v15, 4  ;;  %v1117_v23 = vrot.slane %v1116_v22, 4  ;;  %v1123_v24 = vsel %vm1024_vm0, %v888_v9, -inf }
  0x49   : > { %v1097_v19 = vmax.f32 %v1095_v4, %v1096_v10  ;;  %v1103_v20 = vrot.slane %v1102_v12, 4  ;;  %v220_v25 = vcombine.high %v212_v11, %v212_v11  ;;  %v221_v26 = vcombine.high %v219_v16, %v219_v16 }
  0x4a   : > { %v1111_v29 = vmax.f32 %v1109_v15, %v1110_v21  ;;  %v1124_v30 = vrot.slane %v1123_v24, 4  ;;  %v1118_v31 = vmax.f32 %v1116_v22, %v1117_v23  ;;  %v228_v17 = vrot.slane %v212_v11, %v2865_v5 }
  0x4b   : > { %v1098_v27 = vrot.slane %v1097_v19, 2  ;;  %v1104_v28 = vmax.f32 %v1102_v12, %v1103_v20  ;;  %v235_v32 = vrot.slane %v219_v16, %v2865_v5  ;;  %v242_v33 = vrot.slane %v220_v25, %v2865_v5 }
  0x4c   : > { %v1112_v36 = vrot.slane %v1111_v29, 2  ;;  %v1125_v37 = vmax.f32 %v1123_v24, %v1124_v30  ;;  %v1119_v38 = vrot.slane %v1118_v31, 2  ;;  %v249_v39 = vrot.slane %v221_v26, %v2865_v5 }
  0x4d   : > { %v1099_v34 = vmax.f32 %v1097_v19, %v1098_v27  ;;  %v1105_v35 = vrot.slane %v1104_v28, 2  ;;  %v250_v40 = vcombine.high %v228_v17, %v228_v17  ;;  %v251_v41 = vcombine.high %v235_v32, %v235_v32  ;;  %v146_v19 = vld [vmem:[%s2859_s19 + $0x30] sm:$0xff] }
  0x4e   : > { %v1113_v44 = vmax.f32 %v1111_v29, %v1112_v36  ;;  %v1126_v45 = vrot.slane %v1125_v37, 2  ;;  %v1120_v46 = vmax.f32 %v1118_v31, %v1119_v38  ;;  %v252_v47 = vcombine.high %v242_v33, %v242_v33  ;;  %v2959_v31 = vld [vmem:[%s2859_s19 + $0x38] sm:$0xff] }
  0x4f   : > { %v1100_v42 = vrot.slane %v1099_v34, 1  ;;  %v1106_v43 = vmax.f32 %v1104_v28, %v1105_v35  ;;  %v551_v48 = vrot.slane %v544_v18, %v2865_v5  ;;  %v558_v49 = vrot.slane %v201_v1, %v2865_v5 }
  0x50   : > { %v1114_v52 = vrot.slane %v1113_v44, 1  ;;  %v1127_v53 = vmax.f32 %v1125_v37, %v1126_v45  ;;  %v1121_v54 = vrot.slane %v1120_v46, 1  ;;  %v567_v56 = vcombine.low %v203_v6, %v2907_v57 }
  0x51   : > { %v1101_v50 = vmax.f32 %v1099_v34, %v1100_v42  ;;  %v1107_v51 = vrot.slane %v1106_v43, 1  ;;  %v559_v55 = vcombine.low %v551_v48, %v558_v49  ;;  %v581_v58 = vrot.slane %v2912_v0, %v2865_v5 }
  0x52   : > { %v1115_v60 = vmax.f32 %v1113_v44, %v1114_v52  ;;  %v1128_v61 = vrot.slane %v1127_v53, 1  ;;  %v2631_v62 = vcombine.high %v2907_v57, %v2912_v0  ;;  %v1122_v63 = vmax.f32 %v1120_v46, %v1121_v54 }
  0x53   : > { %v1108_v59 = vmax.f32 %v1106_v43, %v1107_v51  ;;  %v566_v1 = vrot.slane %v559_v55, %v2865_v5  ;;  %v574_v2 = vrot.slane %v567_v56, %v2865_v5  ;;  %v604_v3 = vrot.slane %v228_v17, %v2865_v5 }
  0x54   : > { %v1129_v4 = vmax.f32 %v1127_v53, %v1128_v61  ;;  %v597_v8 = vrot.slane %v2631_v62, %v2865_v5  ;;  %v613_v9 = vcombine.low %v242_v33, %v250_v40  ;;  %v627_v12 = vrot.slane %v252_v47, %v2865_v5 }
  0x55   : > { %v1197_v6 = vsel %vm1185_vm1, %v1108_v59, %v1101_v50  ;;  %v582_v11 = vcombine.low %v574_v2, %v581_v58  ;;  %v636_v57 = vcombine.low %v235_v32, %v249_v39  ;;  %v650_v18 = vrot.slane %v251_v41, %v2865_v5 }
  0x56   : > { %v1198_v10 = vsel %vm1187_vm2, %v1115_v60, %v1197_v6  ;;  %v605_v15 = vcombine.low %v597_v8, %v604_v3  ;;  %v620_v16 = vrot.slane %v613_v9, %v2865_v5  ;;  %v1025_v23 = vsel %vm1024_vm0, %v566_v1, -inf }
  0x57   : > { %v1199_v0 = vsel %vm1189_vm3, %v1122_v63, %v1198_v10  ;;  %v589_v21 = vrot.slane %v582_v11, %v2865_v5  ;;  %v643_v22 = vrot.slane %v636_v57, %v2865_v5  ;;  %v1026_v27 = vrot.slane %v1025_v23, 4 }
  0x58   : > { %v1200_v20 = vsel %vm1191_vm4, %v1129_v4, %v1199_v0  ;;  %v612_v25 = vrot.slane %v605_v15, %v2865_v5  ;;  %v628_v26 = vcombine.low %v620_v16, %v627_v12  ;;  %v1209_v30 = vrot.slane %v2878_v13, 2 }
  0x59   : > { %v1220_v24 = vsel %vm1217_vm5, %v1200_v20, %v1211_v14  ;;  %v651_v28 = vcombine.low %v643_v22, %v650_v18  ;;  %v1032_v29 = vsel %vm1024_vm0, %v589_v21, -inf  ;;  %v447_v17 = vcombine.high %v146_v19, %v146_v19 }
  0x5a   : > { %1286 = vxpose.xlu1.b32.start.end [1/1] (short) (narrow) %v1220_v24, 16  ;;  %v635_v32 = vrot.slane %v628_v26, %v2865_v5  ;;  %v1027_v33 = vmax.f32 %v1025_v23, %v1026_v27  ;;  %v1033_v34 = vrot.slane %v1032_v29, 4  ;;  %v1039_v7 = vsel %vm1024_vm0, %v612_v25, -inf }
  0x5b   : > { %v658_v14 = vrot.slane %v651_v28, %v2865_v5  ;;  %v1040_v35 = vrot.slane %v1039_v7, 4  ;;  %v454_v36 = vrot.slane %v146_v19, %v2865_v5  ;;  %v461_v37 = vrot.slane %v447_v17, %v2865_v5 }
  0x5c   : > { %v1028_v38 = vrot.slane %v1027_v33, 2  ;;  %v1034_v39 = vmax.f32 %v1032_v29, %v1033_v34  ;;  %v1046_v40 = vsel %vm1024_vm0, %v635_v32, -inf  ;;  %v496_v41 = vcombine.high %v2959_v31, %v2959_v31 }
  0x5d   : > { %v1041_v42 = vmax.f32 %v1039_v7, %v1040_v35  ;;  %v1047_v43 = vrot.slane %v1046_v40, 4  ;;  %v1053_v44 = vsel %vm1024_vm0, %v658_v14, -inf  ;;  %v462_v45 = vcombine.high %v454_v36, %v454_v36 }
  0x5e   : > { %v1029_v46 = vmax.f32 %v1027_v33, %v1028_v38  ;;  %v1035_v47 = vrot.slane %v1034_v39, 2  ;;  %v1054_v48 = vrot.slane %v1053_v44, 4  ;;  %v463_v49 = vcombine.high %v461_v37, %v461_v37  ;;  %v142_v38 = vld [vmem:[%s2859_s19 + $0x10] sm:$0xff] }
  0x5f   : > { %v1042_v50 = vrot.slane %v1041_v42, 2  ;;  %v1048_v51 = vmax.f32 %v1046_v40, %v1047_v43  ;;  %v470_v52 = vrot.slane %v454_v36, %v2865_v5  ;;  %v477_v53 = vrot.slane %v461_v37, %v2865_v5 }
  0x60   : > { %v1030_v54 = vrot.slane %v1029_v46, 1  ;;  %v1036_v55 = vmax.f32 %v1034_v39, %v1035_v47  ;;  %v1055_v56 = vmax.f32 %v1053_v44, %v1054_v48  ;;  %v484_v58 = vrot.slane %v462_v45, %v2865_v5 }
  0x61   : > { %v1043_v59 = vmax.f32 %v1041_v42, %v1042_v50  ;;  %v1049_v60 = vrot.slane %v1048_v51, 2  ;;  %v491_v61 = vrot.slane %v463_v49, %v2865_v5  ;;  %v492_v62 = vcombine.high %v470_v52, %v470_v52 }
  0x62   : > { %v1031_v63 = vmax.f32 %v1029_v46, %v1030_v54  ;;  %v1037_v1 = vrot.slane %v1036_v55, 1  ;;  %v1056_v2 = vrot.slane %v1055_v56, 2  ;;  %v494_v3 = vcombine.high %v484_v58, %v484_v58 }
  0x63   : > { %v1044_v4 = vrot.slane %v1043_v59, 1  ;;  %v1050_v6 = vmax.f32 %v1048_v51, %v1049_v60  ;;  %v503_v8 = vrot.slane %v2959_v31, %v2865_v5  ;;  %v510_v9 = vrot.slane %v496_v41, %v2865_v5 }
  0x64   : > { %v1038_v10 = vmax.f32 %v1036_v55, %v1037_v1  ;;  %v1057_v11 = vmax.f32 %v1055_v56, %v1056_v2  ;;  %v889_v12 = vcombine.low %v470_v52, %v484_v58  ;;  %v903_v57 = vrot.slane %v492_v62, %v2865_v5 }
  0x65   : > { %v1045_v0 = vmax.f32 %v1043_v59, %v1044_v4  ;;  %v1051_v15 = vrot.slane %v1050_v6, 1  ;;  %v511_v16 = vcombine.high %v503_v8, %v503_v8  ;;  %v512_v18 = vcombine.high %v510_v9, %v510_v9 }
  0x66   : > { %v1058_v19 = vrot.slane %v1057_v11, 1  ;;  %v1186_v20 = vsel %vm1185_vm1, %v1038_v10, %v1031_v63  ;;  %v519_v21 = vrot.slane %v503_v8, %v2865_v5  ;;  %v526_v22 = vrot.slane %v510_v9, %v2865_v5 }
  0x67   : > { %v1052_v23 = vmax.f32 %v1050_v6, %v1051_v15  ;;  %v1188_v24 = vsel %vm1187_vm2, %v1045_v0, %v1186_v20  ;;  %v533_v25 = vrot.slane %v511_v16, %v2865_v5  ;;  %v540_v26 = vrot.slane %v512_v18, %v2865_v5 }
  0x68   : > { %v1059_v27 = vmax.f32 %v1057_v11, %v1058_v19  ;;  %v541_v28 = vcombine.high %v519_v21, %v519_v21  ;;  %v542_v29 = vcombine.high %v526_v22, %v526_v22  ;;  %v896_v17 = vrot.slane %v889_v12, %v2865_v5  ;;  %v3016_v12 = vld [vmem:[%s2859_s19 + $0x18] sm:$0xff] }
  0x69   : > { %v1190_v32 = vsel %vm1189_vm3, %v1052_v23, %v1188_v24  ;;  %v543_v33 = vcombine.high %v533_v25, %v533_v25  ;;  %v912_v34 = vcombine.low %v494_v3, %v477_v53  ;;  %v926_v7 = vrot.slane %v491_v61, %v2865_v5 }
  0x6a   : > { %v1192_v14 = vsel %vm1191_vm4, %v1059_v27, %v1190_v32  ;;  %v904_v35 = vcombine.low %v896_v17, %v903_v57  ;;  %v2634_v36 = vcombine.high %v477_v53, %v491_v61  ;;  %v949_v37 = vrot.slane %v519_v21, %v2865_v5 }
  0x6b   : > { %v1218_v39 = vsel %vm1217_vm5, %v1192_v14, %v1209_v30  ;;  %v919_v40 = vrot.slane %v912_v34, %v2865_v5  ;;  %v958_v41 = vcombine.low %v533_v25, %v541_v28  ;;  %v972_v42 = vrot.slane %v543_v33, %v2865_v5 }
  0x6c   : > { %1222 = vxpose.xlu0.b32.start.end [1/1] (short) (narrow) %v1218_v39, 16  ;;  %v911_v43 = vrot.slane %v904_v35, %v2865_v5  ;;  %v942_v44 = vrot.slane %v2634_v36, %v2865_v5  ;;  %v981_v45 = vcombine.low %v526_v22, %v540_v26  ;;  %v995_v46 = vrot.slane %v542_v29, %v2865_v5 }
  0x6d   : > { %v927_v47 = vcombine.low %v919_v40, %v926_v7  ;;  %v965_v48 = vrot.slane %v958_v41, %v2865_v5  ;;  %v1212_v13 = vrot.slane %v2959_v31, 2  ;;  %v253_v49 = vcombine.high %v142_v38, %v142_v38 }
  0x6e   : > { %v950_v30 = vcombine.low %v942_v44, %v949_v37  ;;  %v988_v50 = vrot.slane %v981_v45, %v2865_v5  ;;  %v1130_v51 = vsel %vm1024_vm0, %v911_v43, -inf  ;;  %v260_v52 = vrot.slane %v142_v38, %v2865_v5 }
  0x6f   : > { %v934_v53 = vrot.slane %v927_v47, %v2865_v5  ;;  %v973_v54 = vcombine.low %v965_v48, %v972_v42  ;;  %v1131_v55 = vrot.slane %v1130_v51, 4  ;;  %v267_v56 = vrot.slane %v253_v49, %v2865_v5 }
  0x70   : > { %v957_v58 = vrot.slane %v950_v30, %v2865_v5  ;;  %v996_v59 = vcombine.low %v988_v50, %v995_v46  ;;  %v268_v60 = vcombine.high %v260_v52, %v260_v52  ;;  %v276_v61 = vrot.slane %v260_v52, %v2865_v5 }
  0x71   : > { %v980_v62 = vrot.slane %v973_v54, %v2865_v5  ;;  %v1132_v63 = vmax.f32 %v1130_v51, %v1131_v55  ;;  %v1137_v1 = vsel %vm1024_vm0, %v934_v53, -inf  ;;  %v269_v2 = vcombine.high %v267_v56, %v267_v56 }
  0x72   : > { %v1003_v3 = vrot.slane %v996_v59, %v2865_v5  ;;  %v1138_v4 = vrot.slane %v1137_v1, 4  ;;  %v1144_v6 = vsel %vm1024_vm0, %v957_v58, -inf  ;;  %v3012_v8 = vrot.slane %v267_v56, %v2865_v5 }
  0x73   : > { %v1133_v9 = vrot.slane %v1132_v63, 2  ;;  %v1145_v10 = vrot.slane %v1144_v6, 4  ;;  %v1151_v11 = vsel %vm1024_vm0, %v980_v62, -inf  ;;  %v290_v57 = vrot.slane %v268_v60, %v2865_v5 }
  0x74   : > { %v1139_v0 = vmax.f32 %v1137_v1, %v1138_v4  ;;  %v1152_v15 = vrot.slane %v1151_v11, 4  ;;  %v1158_v16 = vsel %vm1024_vm0, %v1003_v3, -inf  ;;  %v297_v18 = vrot.slane %v269_v2, %v2865_v5 }
  0x75   : > { %v1134_v19 = vmax.f32 %v1132_v63, %v1133_v9  ;;  %v1146_v20 = vmax.f32 %v1144_v6, %v1145_v10  ;;  %v1159_v21 = vrot.slane %v1158_v16, 4  ;;  %v298_v22 = vcombine.high %v276_v61, %v276_v61 }
  0x76   : > { %v1140_v23 = vrot.slane %v1139_v0, 2  ;;  %v1153_v24 = vmax.f32 %v1151_v11, %v1152_v15  ;;  %v300_v25 = vcombine.high %v290_v57, %v290_v57  ;;  %v302_v26 = vcombine.high %v3016_v12, %v3016_v12 }
  0x77   : > { %v1135_v27 = vrot.slane %v1134_v19, 1  ;;  %v1147_v28 = vrot.slane %v1146_v20, 2  ;;  %v1160_v29 = vmax.f32 %v1158_v16, %v1159_v21  ;;  %v309_v17 = vrot.slane %v3016_v12, %v2865_v5 }
  0x78   : > { %v1141_v32 = vmax.f32 %v1139_v0, %v1140_v23  ;;  %v1154_v33 = vrot.slane %v1153_v24, 2  ;;  %v316_v34 = vrot.slane %v302_v26, %v2865_v5  ;;  %v659_v7 = vcombine.low %v276_v61, %v290_v57 }
  0x79   : > { %v1136_v14 = vmax.f32 %v1134_v19, %v1135_v27  ;;  %v1148_v35 = vmax.f32 %v1146_v20, %v1147_v28  ;;  %v1161_v36 = vrot.slane %v1160_v29, 2  ;;  %v317_v37 = vcombine.high %v309_v17, %v309_v17 }
  0x7a   : > { %v1142_v38 = vrot.slane %v1141_v32, 1  ;;  %v1155_v39 = vmax.f32 %v1153_v24, %v1154_v33  ;;  %v318_v40 = vcombine.high %v316_v34, %v316_v34  ;;  %v325_v41 = vrot.slane %v309_v17, %v2865_v5 }
  0x7b   : > { %v1149_v42 = vrot.slane %v1148_v35, 1  ;;  %v1162_v43 = vmax.f32 %v1160_v29, %v1161_v36  ;;  %v332_v44 = vrot.slane %v316_v34, %v2865_v5  ;;  %v339_v45 = vrot.slane %v317_v37, %v2865_v5 }
  0x7c   : > { %v1143_v46 = vmax.f32 %v1141_v32, %v1142_v38  ;;  %v1156_v47 = vrot.slane %v1155_v39, 1  ;;  %v346_v48 = vrot.slane %v318_v40, %v2865_v5  ;;  %v347_v49 = vcombine.high %v325_v41, %v325_v41 }
  0x7d   : > { %v1150_v30 = vmax.f32 %v1148_v35, %v1149_v42  ;;  %v1163_v50 = vrot.slane %v1162_v43, 1  ;;  %v348_v51 = vcombine.high %v332_v44, %v332_v44  ;;  %v349_v52 = vcombine.high %v339_v45, %v339_v45 }
  0x7e   : > { %v1157_v53 = vmax.f32 %v1155_v39, %v1156_v47  ;;  %v1201_v54 = vsel %vm1185_vm1, %v1143_v46, %v1136_v14  ;;  %v666_v55 = vrot.slane %v659_v7, %v2865_v5  ;;  %v673_v56 = vrot.slane %v298_v22, %v2865_v5 }
  0x7f   : > { %v1164_v58 = vmax.f32 %v1162_v43, %v1163_v50  ;;  %v1202_v59 = vsel %vm1187_vm2, %v1150_v30, %v1201_v54  ;;  %v682_v60 = vcombine.low %v300_v25, %v3012_v8  ;;  %v696_v61 = vrot.slane %v297_v18, %v2865_v5 }
  0x80   : > { %v1203_v62 = vsel %vm1189_vm3, %v1157_v53, %v1202_v59  ;;  %v674_v63 = vcombine.low %v666_v55, %v673_v56  ;;  %v2632_v1 = vcombine.high %v3012_v8, %v297_v18  ;;  %v719_v2 = vrot.slane %v325_v41, %v2865_v5 }
  0x81   : > { %v1204_v3 = vsel %vm1191_vm4, %v1164_v58, %v1203_v62  ;;  %v689_v4 = vrot.slane %v682_v60, %v2865_v5  ;;  %v728_v6 = vcombine.low %v339_v45, %v347_v49  ;;  %v742_v9 = vrot.slane %v349_v52, %v2865_v5 }
  0x82   : > { %v1221_v10 = vsel %vm1217_vm5, %v1204_v3, %v1212_v13  ;;  %v681_v11 = vrot.slane %v674_v63, %v2865_v5  ;;  %v712_v57 = vrot.slane %v2632_v1, %v2865_v5  ;;  %v751_v0 = vcombine.low %v332_v44, %v346_v48 }
  0x83   : > { %1318 = vxpose.xlu1.b32.start.end [1/1] (short) (narrow) %v1221_v10, 16  ;;  %v697_v8 = vcombine.low %v689_v4, %v696_v61  ;;  %v735_v15 = vrot.slane %v728_v6, %v2865_v5  ;;  %v765_v16 = vrot.slane %v348_v51, %v2865_v5  ;;  %v1210_v58 = vrot.slane %v3016_v12, 2 }
  0x84   : > { %v720_v18 = vcombine.low %v712_v57, %v719_v2  ;;  %v758_v19 = vrot.slane %v751_v0, %v2865_v5  ;;  %v1060_v20 = vsel %vm1024_vm0, %v681_v11, -inf }
  0x85   : > { %v704_v31 = vrot.slane %v697_v8, %v2865_v5  ;;  %v743_v21 = vcombine.low %v735_v15, %v742_v9  ;;  %v1061_v13 = vrot.slane %v1060_v20, 4 }
  0x86   : > { %v727_v22 = vrot.slane %v720_v18, %v2865_v5  ;;  %v766_v23 = vcombine.low %v758_v19, %v765_v16 }
  0x87   : > { %v750_v24 = vrot.slane %v743_v21, %v2865_v5  ;;  %v1062_v25 = vmax.f32 %v1060_v20, %v1061_v13  ;;  %v1067_v26 = vsel %vm1024_vm0, %v704_v31, -inf }
  0x88   : > { %v773_v27 = vrot.slane %v766_v23, %v2865_v5  ;;  %v1068_v28 = vrot.slane %v1067_v26, 4  ;;  %v1074_v29 = vsel %vm1024_vm0, %v727_v22, -inf }
  0x89   : > { %v1063_v17 = vrot.slane %v1062_v25, 2  ;;  %v1075_v32 = vrot.slane %v1074_v29, 4  ;;  %v1081_v33 = vsel %vm1024_vm0, %v750_v24, -inf }
  0x8a   : > { %v1069_v34 = vmax.f32 %v1067_v26, %v1068_v28  ;;  %v1082_v7 = vrot.slane %v1081_v33, 4  ;;  %v1088_v14 = vsel %vm1024_vm0, %v773_v27, -inf }
  0x8b   : > { %v1064_v35 = vmax.f32 %v1062_v25, %v1063_v17  ;;  %v1076_v36 = vmax.f32 %v1074_v29, %v1075_v32  ;;  %v1089_v37 = vrot.slane %v1088_v14, 4 }
  0x8c   : > { %v1070_v38 = vrot.slane %v1069_v34, 2  ;;  %v1083_v39 = vmax.f32 %v1081_v33, %v1082_v7 }
  0x8d   : > { %v1065_v40 = vrot.slane %v1064_v35, 1  ;;  %v1077_v41 = vrot.slane %v1076_v36, 2  ;;  %v1090_v42 = vmax.f32 %v1088_v14, %v1089_v37 }
  0x8e   : > { %v1071_v43 = vmax.f32 %v1069_v34, %v1070_v38  ;;  %v1084_v44 = vrot.slane %v1083_v39, 2 }
  0x8f   : > { %v1078_v45 = vmax.f32 %v1076_v36, %v1077_v41  ;;  %v1091_v46 = vrot.slane %v1090_v42, 2  ;;  %v1066_v47 = vmax.f32 %v1064_v35, %v1065_v40 }
  0x90   : > { %v1072_v48 = vrot.slane %v1071_v43, 1  ;;  %v1085_v49 = vmax.f32 %v1083_v39, %v1084_v44 }
  0x91   : > { %v1079_v30 = vrot.slane %v1078_v45, 1  ;;  %v1092_v50 = vmax.f32 %v1090_v42, %v1091_v46 }
  0x92   : > { %v1073_v51 = vmax.f32 %v1071_v43, %v1072_v48  ;;  %v1086_v52 = vrot.slane %v1085_v49, 1 }
  0x93   : > { %v1080_v53 = vmax.f32 %v1078_v45, %v1079_v30  ;;  %v1093_v54 = vrot.slane %v1092_v50, 1 }
  0x94   : > { %v1087_v55 = vmax.f32 %v1085_v49, %v1086_v52  ;;  %v1193_v56 = vsel %vm1185_vm1, %v1073_v51, %v1066_v47 }
  0x95   : > { %v1094_v59 = vmax.f32 %v1092_v50, %v1093_v54  ;;  %v1194_v60 = vsel %vm1187_vm2, %v1080_v53, %v1193_v56 }
  0x96   : > { %v1195_v61 = vsel %vm1189_vm3, %v1087_v55, %v1194_v60 }
  0x97   : > { %v1196_v62 = vsel %vm1191_vm4, %v1094_v59, %v1195_v61 }
  0x98   : > { %v1219_v63 = vsel %vm1217_vm5, %v1196_v62, %v1210_v58 }
  0x99   : > { %1254 = vxpose.xlu0.b32.start.end [1/1] (short) (narrow) %v1219_v63, 16 }
  0xda   : > { %v1302_v1 = vpop.trf.xlu1 }
  0xdb   : > { %v1552_v2 = vcombine.high %v1302_v1, %v1302_v1  ;;  %v1559_v3 = vrot.slane %v1302_v1, %v2865_v5 }
  0xdd   : > { %v1566_v4 = vrot.slane %v1552_v2, %v2865_v5  ;;  %v1567_v6 = vcombine.high %v1559_v3, %v1559_v3  ;;  %v1575_v9 = vrot.slane %v1559_v3, %v2865_v5 }
  0xde   : > { %v3068_v12 = vpop.trf.xlu1 }
  0xdf   : > { %v1568_v10 = vcombine.high %v1566_v4, %v1566_v4  ;;  %v1582_v11 = vrot.slane %v1566_v4, %v2865_v5  ;;  %v1589_v57 = vrot.slane %v1567_v6, %v2865_v5  ;;  %v1597_v0 = vcombine.high %v1575_v9, %v1575_v9 }
  0xe0   : > { %v1601_v8 = vcombine.high %v3068_v12, %v3068_v12  ;;  %v1608_v15 = vrot.slane %v3068_v12, %v2865_v5 }
  0xe1   : > { %v1596_v16 = vrot.slane %v1568_v10, %v2865_v5  ;;  %v1599_v18 = vcombine.high %v1589_v57, %v1589_v57  ;;  %v1976_v19 = vcombine.low %v1575_v9, %v1589_v57  ;;  %v1990_v20 = vrot.slane %v1597_v0, %v2865_v5 }
  0xe2   : > { %v1615_v31 = vrot.slane %v1601_v8, %v2865_v5  ;;  %v1616_v21 = vcombine.high %v1608_v15, %v1608_v15  ;;  %v1624_v13 = vrot.slane %v1608_v15, %v2865_v5 }
  0xe3   : > { %v1983_v22 = vrot.slane %v1976_v19, %v2865_v5  ;;  %v1999_v23 = vcombine.low %v1599_v18, %v1582_v11  ;;  %v2013_v24 = vrot.slane %v1596_v16, %v2865_v5  ;;  %v2637_v25 = vcombine.high %v1582_v11, %v1596_v16 }
  0xe4   : > { %v1617_v26 = vcombine.high %v1615_v31, %v1615_v31  ;;  %v1631_v27 = vrot.slane %v1615_v31, %v2865_v5  ;;  %v1638_v28 = vrot.slane %v1616_v21, %v2865_v5  ;;  %v1646_v29 = vcombine.high %v1624_v13, %v1624_v13 }
  0xe5   : > { %v1991_v17 = vcombine.low %v1983_v22, %v1990_v20  ;;  %v2006_v32 = vrot.slane %v1999_v23, %v2865_v5  ;;  %v2029_v33 = vrot.slane %v2637_v25, %v2865_v5  ;;  %v2036_v34 = vrot.slane %v1624_v13, %v2865_v5 }
  0xe6   : > { %v1645_v7 = vrot.slane %v1617_v26, %v2865_v5  ;;  %v1647_v14 = vcombine.high %v1631_v27, %v1631_v27  ;;  %v1648_v35 = vcombine.high %v1638_v28, %v1638_v28  ;;  %v2045_v36 = vcombine.low %v1638_v28, %v1646_v29 }
  0xe7   : > { %v1998_v37 = vrot.slane %v1991_v17, %v2865_v5  ;;  %v2014_v38 = vcombine.low %v2006_v32, %v2013_v24  ;;  %v2037_v39 = vcombine.low %v2029_v33, %v2036_v34 }
  0xe8   : > { %v2052_v40 = vrot.slane %v2045_v36, %v2865_v5  ;;  %v2059_v41 = vrot.slane %v1648_v35, %v2865_v5  ;;  %v2068_v42 = vcombine.low %v1631_v27, %v1645_v7  ;;  %v2082_v46 = vrot.slane %v1647_v14, %v2865_v5 }
  0xe9   : > { %v2021_v43 = vrot.slane %v2014_v38, %v2865_v5  ;;  %v2297_v44 = vsel %vm2226_vm6, %v1998_v37, -inf  ;;  %v2044_v45 = vrot.slane %v2037_v39, %v2865_v5 }
  0xea   : > { %v2298_v47 = vrot.slane %v2297_v44, 4  ;;  %v2060_v48 = vcombine.low %v2052_v40, %v2059_v41  ;;  %v2075_v49 = vrot.slane %v2068_v42, %v2865_v5 }
  0xeb   : > { %v2304_v30 = vsel %vm2226_vm6, %v2021_v43, -inf  ;;  %v2311_v50 = vsel %vm2226_vm6, %v2044_v45, -inf }
  0xec   : > { %v2299_v51 = vmax.f32 %v2297_v44, %v2298_v47  ;;  %v2305_v52 = vrot.slane %v2304_v30, 4  ;;  %v1238_v53 = vpop.trf.xlu0  ;;  %v2067_v54 = vrot.slane %v2060_v48, %v2865_v5  ;;  %v2083_v55 = vcombine.low %v2075_v49, %v2082_v46 }
  0xed   : > { %v2312_v56 = vrot.slane %v2311_v50, 4  ;;  %v1358_v59 = vcombine.high %v1238_v53, %v1238_v53  ;;  %v1365_v60 = vrot.slane %v1238_v53, %v2865_v5 }
  0xee   : > { %v2300_v58 = vrot.slane %v2299_v51, 2  ;;  %v2306_v61 = vmax.f32 %v2304_v30, %v2305_v52  ;;  %v2090_v4 = vrot.slane %v2083_v55, %v2865_v5  ;;  %v2318_v6 = vsel %vm2226_vm6, %v2067_v54, -inf }
  0xef   : > { %v2313_v62 = vmax.f32 %v2311_v50, %v2312_v56  ;;  %v1372_v63 = vrot.slane %v1358_v59, %v2865_v5  ;;  %v1373_v1 = vcombine.high %v1365_v60, %v1365_v60  ;;  %v1381_v2 = vrot.slane %v1365_v60, %v2865_v5 }
  0xf0   : > { %v3102_v3 = vpop.trf.xlu0  ;;  %v3107_v57 = vmax.f32 %v2299_v51, %v2300_v58  ;;  %v2307_v15 = vrot.slane %v2306_v61, 2  ;;  %v2319_v42 = vrot.slane %v2318_v6, 4  ;;  %v2325_v46 = vsel %vm2226_vm6, %v2090_v4, -inf }
  0xf1   : > { %v1374_v9 = vcombine.high %v1372_v63, %v1372_v63  ;;  %v1395_v10 = vrot.slane %v1373_v1, %v2865_v5  ;;  %v1403_v11 = vcombine.high %v1381_v2, %v1381_v2  ;;  %v1407_v0 = vcombine.high %v3102_v3, %v3102_v3 }
  0xf2   : > { %v1414_v8 = vrot.slane %v3102_v3, %v2865_v5  ;;  %v2314_v16 = vrot.slane %v2313_v62, 2  ;;  %v1388_v18 = vrot.slane %v1372_v63, %v2865_v5  ;;  %v2308_v30 = vmax.f32 %v2306_v61, %v2307_v15 }
  0xf3   : > { %v1402_v19 = vrot.slane %v1374_v9, %v2865_v5  ;;  %v1405_v20 = vcombine.high %v1395_v10, %v1395_v10  ;;  %v1746_v31 = vcombine.low %v1381_v2, %v1395_v10  ;;  %v1760_v21 = vrot.slane %v1403_v11, %v2865_v5 }
  0xf4   : > { %v1421_v13 = vrot.slane %v1407_v0, %v2865_v5  ;;  %v1422_v22 = vcombine.high %v1414_v8, %v1414_v8  ;;  %v1430_v23 = vrot.slane %v1414_v8, %v2865_v5  ;;  %v2315_v56 = vmax.f32 %v2313_v62, %v2314_v16 }
  0xf5   : > { %v1753_v24 = vrot.slane %v1746_v31, %v2865_v5  ;;  %v1769_v25 = vcombine.low %v1405_v20, %v1388_v18  ;;  %v1783_v26 = vrot.slane %v1402_v19, %v2865_v5  ;;  %v2635_v27 = vcombine.high %v1388_v18, %v1402_v19 }
  0xf6   : > { %v1423_v28 = vcombine.high %v1421_v13, %v1421_v13  ;;  %v1437_v29 = vrot.slane %v1421_v13, %v2865_v5  ;;  %v1444_v17 = vrot.slane %v1422_v22, %v2865_v5  ;;  %v1452_v32 = vcombine.high %v1430_v23, %v1430_v23 }
  0xf7   : > { %v1761_v33 = vcombine.low %v1753_v24, %v1760_v21  ;;  %v1776_v34 = vrot.slane %v1769_v25, %v2865_v5  ;;  %v1799_v7 = vrot.slane %v2635_v27, %v2865_v5  ;;  %v1806_v14 = vrot.slane %v1430_v23, %v2865_v5 }
  0xf8   : > { %v1451_v35 = vrot.slane %v1423_v28, %v2865_v5  ;;  %v1453_v36 = vcombine.high %v1437_v29, %v1437_v29  ;;  %v1454_v37 = vcombine.high %v1444_v17, %v1444_v17  ;;  %v1815_v38 = vcombine.low %v1444_v17, %v1452_v32 }
  0xf9   : > { %v1768_v39 = vrot.slane %v1761_v33, %v2865_v5  ;;  %v1784_v40 = vcombine.low %v1776_v34, %v1783_v26  ;;  %v1807_v41 = vcombine.low %v1799_v7, %v1806_v14  ;;  %v2320_v58 = vmax.f32 %v2318_v6, %v2319_v42 }
  0xfa   : > { %v1822_v43 = vrot.slane %v1815_v38, %v2865_v5  ;;  %v1829_v44 = vrot.slane %v1454_v37, %v2865_v5  ;;  %v1838_v45 = vcombine.low %v1437_v29, %v1451_v35  ;;  %v1852_v53 = vrot.slane %v1453_v36, %v2865_v5 }
  0xfb   : > { %v1791_v47 = vrot.slane %v1784_v40, %v2865_v5  ;;  %v2227_v48 = vsel %vm2226_vm6, %v1768_v39, -inf  ;;  %v1814_v49 = vrot.slane %v1807_v41, %v2865_v5  ;;  %v2407_v61 = vrot.slane %v3102_v3, 2 }
  0xfc   : > { %v2228_v50 = vrot.slane %v2227_v48, 4  ;;  %v1830_v51 = vcombine.low %v1822_v43, %v1829_v44  ;;  %v1845_v52 = vrot.slane %v1838_v45, %v2865_v5  ;;  %v2302_v4 = vrot.slane %v3107_v57, 1 }
  0xfd   : > { %v2234_v54 = vsel %vm2226_vm6, %v1791_v47, -inf  ;;  %v2241_v55 = vsel %vm2226_vm6, %v1814_v49, -inf  ;;  %v2321_v9 = vrot.slane %v2320_v58, 2  ;;  %v2309_v6 = vrot.slane %v2308_v30, 1 }
  0xfe   : > { %v2229_v59 = vmax.f32 %v2227_v48, %v2228_v50  ;;  %v2235_v60 = vrot.slane %v2234_v54, 4  ;;  %v1837_v63 = vrot.slane %v1830_v51, %v2865_v5  ;;  %v1853_v1 = vcombine.low %v1845_v52, %v1852_v53 }
  0xff   : > { %v2242_v2 = vrot.slane %v2241_v55, 4  ;;  %v2316_v16 = vrot.slane %v2315_v56, 1  ;;  %v3143_v20 = vmax.f32 %v2320_v58, %v2321_v9  ;;  %v2326_v31 = vrot.slane %v2325_v46, 4 }
 0x100   : > { %v2230_v10 = vrot.slane %v2229_v59, 2  ;;  %v2236_v11 = vmax.f32 %v2234_v54, %v2235_v60  ;;  %v1860_v0 = vrot.slane %v1853_v1, %v2865_v5  ;;  %v2248_v8 = vsel %vm2226_vm6, %v1837_v63, -inf }
 0x101   : > { %v2243_v15 = vmax.f32 %v2241_v55, %v2242_v2  ;;  %v2249_v62 = vrot.slane %v2248_v8, 4  ;;  %v3147_v28 = vmax.f32 %v3107_v57, %v2302_v4  ;;  %v3149_v32 = vmax.f32 %v2308_v30, %v2309_v6 }
 0x102   : > { %v2237_v18 = vrot.slane %v2236_v11, 2  ;;  %v2255_v19 = vsel %vm2226_vm6, %v1860_v0, -inf  ;;  %v2231_v13 = vmax.f32 %v2229_v59, %v2230_v10  ;;  %v3151_v33 = vmax.f32 %v2315_v56, %v2316_v16 }
 0x103   : > { %v1334_v21 = vpop.trf.xlu1  ;;  %v2244_v22 = vrot.slane %v2243_v15, 2  ;;  %v2250_v23 = vmax.f32 %v2248_v8, %v2249_v62  ;;  %v2256_v24 = vrot.slane %v2255_v19, 4  ;;  %v3155_v35 = vmax.f32 %v2325_v46, %v2326_v31 }
 0x104   : > { %v1649_v25 = vcombine.high %v1334_v21, %v1334_v21  ;;  %v1656_v26 = vrot.slane %v1334_v21, %v2865_v5  ;;  %v2238_v27 = vmax.f32 %v2236_v11, %v2237_v18  ;;  %v2232_v37 = vrot.slane %v2231_v13, 1 }
 0x105   : > { %v2245_v29 = vmax.f32 %v2243_v15, %v2244_v22  ;;  %v2251_v17 = vrot.slane %v2250_v23, 2  ;;  %v2257_v39 = vmax.f32 %v2255_v19, %v2256_v24  ;;  %v2323_v57 = vrot.slane %v3143_v20, 1 }
 0x106   : > { %v1663_v34 = vrot.slane %v1649_v25, %v2865_v5  ;;  %v1664_v7 = vcombine.high %v1656_v26, %v1656_v26  ;;  %v1672_v14 = vrot.slane %v1656_v26, %v2865_v5  ;;  %v2239_v38 = vrot.slane %v2238_v27, 1 }
 0x107   : > { %v3157_v36 = vpop.trf.xlu1  ;;  %v2246_v46 = vrot.slane %v2245_v29, 1  ;;  %v2252_v47 = vmax.f32 %v2250_v23, %v2251_v17  ;;  %v2258_v54 = vrot.slane %v2257_v39, 2  ;;  %v2233_v22 = vmax.f32 %v2231_v13, %v2232_v37 }
 0x108   : > { %v1665_v40 = vcombine.high %v1663_v34, %v1663_v34  ;;  %v1679_v41 = vrot.slane %v1663_v34, %v2865_v5  ;;  %v1686_v42 = vrot.slane %v1664_v7, %v2865_v5  ;;  %v1694_v43 = vcombine.high %v1672_v14, %v1672_v14 }
 0x109   : > { %v1698_v44 = vcombine.high %v3157_v36, %v3157_v36  ;;  %v1705_v45 = vrot.slane %v3157_v36, %v2865_v5  ;;  %v2240_v62 = vmax.f32 %v2238_v27, %v2239_v38  ;;  %v2253_v19 = vrot.slane %v2252_v47, 1 }
 0x10a   : > { %v1693_v48 = vrot.slane %v1665_v40, %v2865_v5  ;;  %v1696_v49 = vcombine.high %v1686_v42, %v1686_v42  ;;  %v2091_v30 = vcombine.low %v1672_v14, %v1686_v42  ;;  %v2105_v50 = vrot.slane %v1694_v43, %v2865_v5 }
 0x10b   : > { %v1712_v51 = vrot.slane %v1698_v44, %v2865_v5  ;;  %v1713_v52 = vcombine.high %v1705_v45, %v1705_v45  ;;  %v1721_v53 = vrot.slane %v1705_v45, %v2865_v5  ;;  %v2324_v23 = vmax.f32 %v3143_v20, %v2323_v57 }
 0x10c   : > { %v2098_v55 = vrot.slane %v2091_v30, %v2865_v5  ;;  %v2114_v56 = vcombine.low %v1696_v49, %v1679_v41  ;;  %v2128_v58 = vrot.slane %v1693_v48, %v2865_v5  ;;  %v2638_v59 = vcombine.high %v1679_v41, %v1693_v48 }
 0x10d   : > { %v1714_v60 = vcombine.high %v1712_v51, %v1712_v51  ;;  %v1728_v63 = vrot.slane %v1712_v51, %v2865_v5  ;;  %v1735_v1 = vrot.slane %v1713_v52, %v2865_v5  ;;  %v1743_v2 = vcombine.high %v1721_v53, %v1721_v53 }
 0x10e   : > { %v2106_v4 = vcombine.low %v2098_v55, %v2105_v50  ;;  %v2121_v9 = vrot.slane %v2114_v56, %v2865_v5  ;;  %v2144_v10 = vrot.slane %v2638_v59, %v2865_v5  ;;  %v2151_v11 = vrot.slane %v1721_v53, %v2865_v5 }
 0x10f   : > { %v1742_v0 = vrot.slane %v1714_v60, %v2865_v5  ;;  %v1745_v8 = vcombine.high %v1735_v1, %v1735_v1  ;;  %v2160_v15 = vcombine.low %v1735_v1, %v1743_v2  ;;  %v1744_v31 = vcombine.high %v1728_v63, %v1728_v63 }
 0x110   : > { %v2113_v6 = vrot.slane %v2106_v4, %v2865_v5  ;;  %v2129_v16 = vcombine.low %v2121_v9, %v2128_v58  ;;  %v2152_v18 = vcombine.low %v2144_v10, %v2151_v11  ;;  %v2247_v17 = vmax.f32 %v2245_v29, %v2246_v46 }
 0x111   : > { %v2183_v21 = vcombine.low %v1728_v63, %v1742_v0  ;;  %v2167_v27 = vrot.slane %v2160_v15, %v2865_v5  ;;  %v2254_v7 = vmax.f32 %v2252_v47, %v2253_v19  ;;  %v2259_v14 = vmax.f32 %v2257_v39, %v2258_v54 }
 0x112   : > { %v2136_v24 = vrot.slane %v2129_v16, %v2865_v5  ;;  %v2332_v25 = vsel %vm2226_vm6, %v2113_v6, -inf  ;;  %v2159_v26 = vrot.slane %v2152_v18, %v2865_v5  ;;  %v2174_v40 = vrot.slane %v1745_v8, %v2865_v5 }
 0x113   : > { %v2333_v34 = vrot.slane %v2332_v25, 4  ;;  %v2387_v13 = vsel %vm1185_vm1, %v2240_v62, %v2233_v22  ;;  %v2328_v20 = vrot.slane %v3155_v35, 2  ;;  %v2190_v41 = vrot.slane %v2183_v21, %v2865_v5 }
 0x114   : > { %v2339_v38 = vsel %vm2226_vm6, %v2136_v24, -inf  ;;  %v2197_v42 = vrot.slane %v1744_v31, %v2865_v5  ;;  %v2346_v29 = vsel %vm2226_vm6, %v2159_v26, -inf  ;;  %v2260_v43 = vrot.slane %v2259_v14, 1 }
 0x115   : > { %v2334_v37 = vmax.f32 %v2332_v25, %v2333_v34  ;;  %v2340_v57 = vrot.slane %v2339_v38, 4  ;;  %v2388_v44 = vsel %vm1187_vm2, %v2247_v17, %v2387_v13  ;;  %v2329_v39 = vmax.f32 %v3155_v35, %v2328_v20 }
 0x116   : > { %v2389_v47 = vsel %vm1189_vm3, %v2254_v7, %v2388_v44  ;;  %v2395_v48 = vsel %vm1185_vm1, %v3149_v32, %v3147_v28  ;;  %v3197_v49 = vcombine.low %v2167_v27, %v2174_v40  ;;  %v2261_v30 = vmax.f32 %v2259_v14, %v2260_v43 }
 0x117   : > { %v2335_v45 = vrot.slane %v2334_v37, 2  ;;  %v2341_v46 = vmax.f32 %v2339_v38, %v2340_v57  ;;  %v2330_v50 = vrot.slane %v2329_v39, 1  ;;  %v2396_v51 = vsel %vm1187_vm2, %v3151_v33, %v2395_v48 }
 0x118   : > { %v2198_v53 = vcombine.low %v2190_v41, %v2197_v42  ;;  %v2347_v54 = vrot.slane %v2346_v29, 4  ;;  %v2397_v35 = vsel %vm1189_vm3, %v2324_v23, %v2396_v51  ;;  %v2390_v59 = vsel %vm1191_vm4, %v2261_v30, %v2389_v47 }
 0x119   : > { %v1270_v52 = vpop.trf.xlu0  ;;  %v3202_v55 = vmax.f32 %v2334_v37, %v2335_v45  ;;  %v2331_v28 = vmax.f32 %v2329_v39, %v2330_v50  ;;  %v2415_v32 = vsel %vm1217_vm5, %v2390_v59, %v2407_v61  ;;  %v2342_v60 = vrot.slane %v2341_v46, 2 }
 0x11a   : > { %v1455_v56 = vcombine.high %v1270_v52, %v1270_v52  ;;  %v1462_v58 = vrot.slane %v1270_v52, %v2865_v5  ;;  %2419 = vxpose.xlu0.b32.start.end [1/1] (short) (narrow) %v2415_v32, 8  ;;  %v2409_v4 = vrot.slane %v3068_v12, 2  ;;  %v2182_v9 = vrot.slane %v3197_v49, %v2865_v5 }
 0x11b   : > { %v2398_v2 = vsel %vm1191_vm4, %v2331_v28, %v2397_v35  ;;  %v2348_v10 = vmax.f32 %v2346_v29, %v2347_v54  ;;  %v2205_v3 = vrot.slane %v2198_v53, %v2865_v5  ;;  %v2337_v15 = vrot.slane %v3202_v55, 1 }
 0x11c   : > { %v1469_v33 = vrot.slane %v1455_v56, %v2865_v5  ;;  %v1470_v63 = vcombine.high %v1462_v58, %v1462_v58  ;;  %v1478_v1 = vrot.slane %v1462_v58, %v2865_v5  ;;  %v2417_v6 = vsel %vm1217_vm5, %v2398_v2, %v2409_v4 }
 0x11d   : > { %v3215_v11 = vpop.trf.xlu0  ;;  %v3225_v16 = vmax.f32 %v2341_v46, %v2342_v60  ;;  %v2349_v46 = vrot.slane %v2348_v10, 2  ;;  %v2353_v53 = vsel %vm2226_vm6, %v2182_v9, -inf  ;;  %v2360_v60 = vsel %vm2226_vm6, %v2205_v3, -inf }
 0x11e   : > { %v1471_v61 = vcombine.high %v1469_v33, %v1469_v33  ;;  %v1492_v0 = vrot.slane %v1470_v63, %v2865_v5  ;;  %v1500_v8 = vcombine.high %v1478_v1, %v1478_v1  ;;  %v1504_v62 = vcombine.high %v3215_v11, %v3215_v11  ;;  %2483 = vxpose.xlu0.b32.start.end [1/1] (short) (narrow) %v2417_v6, 8 }
 0x11f   : > { %v1511_v12 = vrot.slane %v3215_v11, %v2865_v5  ;;  %v1485_v18 = vrot.slane %v1469_v33, %v2865_v5  ;;  %v2354_v58 = vrot.slane %v2353_v53, 4  ;;  %v2350_v32 = vmax.f32 %v2348_v10, %v2349_v46 }
 0x120   : > { %v1499_v19 = vrot.slane %v1471_v61, %v2865_v5  ;;  %v1502_v31 = vcombine.high %v1492_v0, %v1492_v0  ;;  %v1861_v21 = vcombine.low %v1478_v1, %v1492_v0  ;;  %v1875_v22 = vrot.slane %v1500_v8, %v2865_v5 }
 0x121   : > { %v1518_v23 = vrot.slane %v1504_v62, %v2865_v5  ;;  %v1519_v24 = vcombine.high %v1511_v12, %v1511_v12  ;;  %v1527_v25 = vrot.slane %v1511_v12, %v2865_v5  ;;  %v2344_v9 = vrot.slane %v3225_v16, 1 }
 0x122   : > { %v1868_v26 = vrot.slane %v1861_v21, %v2865_v5  ;;  %v1884_v17 = vcombine.low %v1502_v31, %v1485_v18  ;;  %v1898_v34 = vrot.slane %v1499_v19, %v2865_v5  ;;  %v2636_v27 = vcombine.high %v1485_v18, %v1499_v19 }
 0x123   : > { %v1520_v7 = vcombine.high %v1518_v23, %v1518_v23  ;;  %v1534_v14 = vrot.slane %v1518_v23, %v2865_v5  ;;  %v1541_v38 = vrot.slane %v1519_v24, %v2865_v5  ;;  %v1549_v40 = vcombine.high %v1527_v25, %v1527_v25 }
 0x124   : > { %v1876_v13 = vcombine.low %v1868_v26, %v1875_v22  ;;  %v1891_v20 = vrot.slane %v1884_v17, %v2865_v5  ;;  %v1914_v37 = vrot.slane %v2636_v27, %v2865_v5  ;;  %v1921_v57 = vrot.slane %v1527_v25, %v2865_v5 }
 0x125   : > { %v1548_v41 = vrot.slane %v1520_v7, %v2865_v5  ;;  %v1550_v42 = vcombine.high %v1534_v14, %v1534_v14  ;;  %v1551_v29 = vcombine.high %v1541_v38, %v1541_v38  ;;  %v1930_v43 = vcombine.low %v1541_v38, %v1549_v40 }
 0x126   : > { %v1883_v44 = vrot.slane %v1876_v13, %v2865_v5  ;;  %v1899_v39 = vcombine.low %v1891_v20, %v1898_v34  ;;  %v1922_v45 = vcombine.low %v1914_v37, %v1921_v57  ;;  %v2355_v61 = vmax.f32 %v2353_v53, %v2354_v58 }
 0x127   : > { %v1937_v47 = vrot.slane %v1930_v43, %v2865_v5  ;;  %v1944_v48 = vrot.slane %v1551_v29, %v2865_v5  ;;  %v1953_v49 = vcombine.low %v1534_v14, %v1548_v41  ;;  %v1967_v30 = vrot.slane %v1550_v42, %v2865_v5 }
 0x128   : > { %v1906_v50 = vrot.slane %v1899_v39, %v2865_v5  ;;  %v2262_v51 = vsel %vm2226_vm6, %v1883_v44, -inf  ;;  %v1929_v52 = vrot.slane %v1922_v45, %v2865_v5  ;;  %v2361_v0 = vrot.slane %v2360_v60, 4 }
 0x129   : > { %v2263_v54 = vrot.slane %v2262_v51, 4  ;;  %v1945_v35 = vcombine.low %v1937_v47, %v1944_v48  ;;  %v1960_v56 = vrot.slane %v1953_v49, %v2865_v5  ;;  %v2356_v19 = vrot.slane %v2355_v61, 2 }
 0x12a   : > { %v2269_v59 = vsel %vm2226_vm6, %v1906_v50, -inf  ;;  %v2276_v28 = vsel %vm2226_vm6, %v1929_v52, -inf  ;;  %v2362_v3 = vmax.f32 %v2360_v60, %v2361_v0  ;;  %v2351_v23 = vrot.slane %v2350_v32, 1 }
 0x12b   : > { %v2264_v33 = vmax.f32 %v2262_v51, %v2263_v54  ;;  %v2270_v63 = vrot.slane %v2269_v59, 4  ;;  %v1952_v1 = vrot.slane %v1945_v35, %v2865_v5  ;;  %v1968_v2 = vcombine.low %v1960_v56, %v1967_v30 }
 0x12c   : > { %v2277_v4 = vrot.slane %v2276_v28, 4  ;;  %v2357_v17 = vmax.f32 %v2355_v61, %v2356_v19  ;;  %v2345_v7 = vmax.f32 %v3225_v16, %v2344_v9  ;;  %v2338_v20 = vmax.f32 %v3202_v55, %v2337_v15 }
 0x12d   : > { %v2265_v8 = vrot.slane %v2264_v33, 2  ;;  %v2271_v62 = vmax.f32 %v2269_v59, %v2270_v63  ;;  %v1975_v12 = vrot.slane %v1968_v2, %v2865_v5  ;;  %v2283_v6 = vsel %vm2226_vm6, %v1952_v1, -inf }
 0x12e   : > { %v2278_v18 = vmax.f32 %v2276_v28, %v2277_v4  ;;  %v2284_v10 = vrot.slane %v2283_v6, 4  ;;  %v2363_v5 = vrot.slane %v2362_v3, 2  ;;  %v2358_v37 = vrot.slane %v2357_v17, 1 }
 0x12f   : > { %v2266_v31 = vmax.f32 %v2264_v33, %v2265_v8  ;;  %v2272_v21 = vrot.slane %v2271_v62, 2  ;;  %v2290_v22 = vsel %vm2226_vm6, %v1975_v12, -inf  ;;  %v2352_v43 = vmax.f32 %v2350_v32, %v2351_v23 }
 0x130   : > { %v2279_v24 = vrot.slane %v2278_v18, 2  ;;  %v2285_v25 = vmax.f32 %v2283_v6, %v2284_v10  ;;  %v2291_v26 = vrot.slane %v2290_v22, 4  ;;  %v2364_v57 = vmax.f32 %v2362_v3, %v2363_v5 }
 0x131   : > { %v2267_v34 = vrot.slane %v2266_v31, 1  ;;  %v2273_v27 = vmax.f32 %v2271_v62, %v2272_v21  ;;  %v2399_v45 = vsel %vm1185_vm1, %v2345_v7, %v2338_v20  ;;  %v2359_v30 = vmax.f32 %v2357_v17, %v2358_v37 }
 0x132   : > { %v2280_v14 = vmax.f32 %v2278_v18, %v2279_v24  ;;  %v2286_v38 = vrot.slane %v2285_v25, 2  ;;  %v2292_v40 = vmax.f32 %v2290_v22, %v2291_v26  ;;  %v2365_v48 = vrot.slane %v2364_v57, 1 }
 0x133   : > { %v2274_v13 = vrot.slane %v2273_v27, 1  ;;  %v2268_v44 = vmax.f32 %v2266_v31, %v2267_v34  ;;  %v2400_v51 = vsel %vm1187_vm2, %v2352_v43, %v2399_v45  ;;  %v2408_v35 = vrot.slane %v3215_v11, 2 }
 0x134   : > { %v2281_v41 = vrot.slane %v2280_v14, 1  ;;  %v2287_v42 = vmax.f32 %v2285_v25, %v2286_v38  ;;  %v2293_v29 = vrot.slane %v2292_v40, 2  ;;  %v2366_v54 = vmax.f32 %v2364_v57, %v2365_v48 }
 0x135   : > { %v2275_v39 = vmax.f32 %v2273_v27, %v2274_v13  ;;  %v2401_v56 = vsel %vm1189_vm3, %v2359_v30, %v2400_v51  ;;  %v2410_v32 = vrot.slane %v3157_v36, 2 }
 0x136   : > { %v2282_v16 = vmax.f32 %v2280_v14, %v2281_v41  ;;  %v2288_v46 = vrot.slane %v2287_v42, 1  ;;  %v2294_v47 = vmax.f32 %v2292_v40, %v2293_v29  ;;  %v2402_v28 = vsel %vm1191_vm4, %v2366_v54, %v2401_v56 }
 0x137   : > { %v2391_v49 = vsel %vm1185_vm1, %v2275_v39, %v2268_v44  ;;  %v2418_v60 = vsel %vm1217_vm5, %v2402_v28, %v2410_v32 }
 0x138   : > { %v2289_v50 = vmax.f32 %v2287_v42, %v2288_v46  ;;  %v2295_v55 = vrot.slane %v2294_v47, 1  ;;  %v2392_v15 = vsel %vm1187_vm2, %v2282_v16, %v2391_v49 }
 0x13a   : > { %v2296_v52 = vmax.f32 %v2294_v47, %v2295_v55  ;;  %v2393_v53 = vsel %vm1189_vm3, %v2289_v50, %v2392_v15 }
 0x13c   : > { %v2394_v58 = vsel %vm1191_vm4, %v2296_v52, %v2393_v53 }
 0x13d   : > { %v2416_v59 = vsel %vm1217_vm5, %v2394_v58, %v2408_v35 }
 0x13e   : > { %2451 = vxpose.xlu1.b32.start.end [1/1] (short) (narrow) %v2416_v59, 8 }
 0x142   : > { %2515 = vxpose.xlu1.b32.start.end [1/1] (short) (narrow) %v2418_v60, 8 }
 0x19a   : > { %v2435_v11 = vpop.trf.xlu0 }
 0x19b   : > { %2548 = vst.msk [vmem:[%s138_s23] sm:$0x3f] %vm2547_vm7, %v2435_v11 }
 0x19e   : > { %v2499_v33 = vpop.trf.xlu0 }
 0x19f   : > { %2550 = vst.msk [vmem:[%s138_s23 + $0x10] sm:$0x3f] %vm2547_vm7, %v2499_v33 }
 0x1be   : > { %v2467_v63 = vpop.trf.xlu1 }
 0x1bf   : > { %2549 = vst.msk [vmem:[%s138_s23 + $0x8] sm:$0x3f] %vm2547_vm7, %v2467_v63 }
 0x1c2   : > { %v2531_v36 = vpop.trf.xlu1 }
 0x1c3   : > { %2551 = vst.msk [vmem:[%s138_s23 + $0x18] sm:$0x3f] %vm2547_vm7, %v2531_v36 }
 0x1c4 PF: > { %p11_p8 = scmp.ge.s32.totalorder %s2794_s11, 4   ;;  %s3296_s6 = smov %s2750_s7 }
 0x1c5   : > { %s3297_s7 = smov %s2754_s8  ;;  %s3298_s8 = smov %s2804_s14 }
 0x1c6   : > { %s3299_s9 = smov %s2794_s11  ;;  %13 = sbr.rel (!%p11_p8) target bundleno = 3 (0x3), region = 64 }
 0x1cd   :  { %2574 = vsyncpa [#allocation3], 1 }
 0x1ce   :  { %2576 = vsyncpa [#allocation3 + $0x1], 1 }

</bundles_post_ra>
